<compile_context>
chip_gen: v7x
topology: tpu7x:2x2x1
jax: 0.10.0
libtpu: 0.0.40
codegen_flags: <defaults>
</compile_context>

<pallas_src>
import functools

import jax
import jax.numpy as jnp
from jax.experimental import pallas as pl
from jax.experimental.pallas import tpu as pltpu


# --------------------------------------------------------------------------- #
# Parameter slab layout
# --------------------------------------------------------------------------- #
def _rup(x, m):
    return ((x + m - 1) // m) * m


def _td3_layout(dim_state, f1, f2, dim_action):
    """Row offsets (8-aligned) / shape of the packed parameter slab."""
    lane = _rup(max(f1, f2, dim_action), 128)
    o_w1 = 0
    o_b1 = _rup(dim_state, 8)
    o_w2 = o_b1 + 8
    o_b2 = o_w2 + _rup(f1, 8)
    o_w3 = o_b2 + 8
    o_b3 = o_w3 + _rup(f2, 8)
    o_sc = o_b3 + 8
    rows = o_sc + 8
    return dict(
        dims=(dim_state, f1, f2, dim_action),
        offsets=(o_w1, o_b1, o_w2, o_b2, o_w3, o_b3, o_sc),
        shape=(rows, lane),
    )


def pack_td3_actor_params(params, action_scaling, dim_state, n_features,
                          dim_action):
    """Packs (w1,b1,w2,b2,w3,b3) + action_scaling into one padded f32 slab."""
    w1, b1, w2, b2, w3, b3 = params
    f1, f2 = n_features
    layout = _td3_layout(dim_state, f1, f2, dim_action)
    rows, lane = layout["shape"]
    o_w1, o_b1, o_w2, o_b2, o_w3, o_b3, o_sc = layout["offsets"]

    scale = jnp.broadcast_to(
        jnp.asarray(action_scaling, jnp.float32).reshape(-1), (dim_action,))

    slab = jnp.zeros((rows, lane), jnp.float32)
    slab = slab.at[o_w1:o_w1 + dim_state, :f1].set(w1.astype(jnp.float32))
    slab = slab.at[o_b1, :f1].set(b1.astype(jnp.float32))
    slab = slab.at[o_w2:o_w2 + f1, :f2].set(w2.astype(jnp.float32))
    slab = slab.at[o_b2, :f2].set(b2.astype(jnp.float32))
    slab = slab.at[o_w3:o_w3 + f2, :dim_action].set(w3.astype(jnp.float32))
    slab = slab.at[o_b3, :dim_action].set(b3.astype(jnp.float32))
    slab = slab.at[o_sc, :dim_action].set(scale)
    return slab, layout


# --------------------------------------------------------------------------- #
# Kernel
# --------------------------------------------------------------------------- #
def _td3_actor_kernel(x_ref, p_ref, a_ref, *, dims, offs, squash, matmul_dtype):
    dim_state, f1, f2, dim_action = dims
    o_w1, o_b1, o_w2, o_b2, o_w3, o_b3, o_sc = offs

    def dense(x, w_off, w_rows, b_off, n_out):
        w = p_ref[w_off:w_off + w_rows, 0:n_out]
        b = p_ref[b_off:b_off + 1, 0:n_out]
        y = jnp.dot(x.astype(matmul_dtype), w.astype(matmul_dtype),
                    preferred_element_type=jnp.float32)
        # bias-add / activation stay in f32 (VPU/EUP path, safe on v5e)
        return y + b

    x = x_ref[...]
    h1 = jnp.maximum(dense(x, o_w1, dim_state, o_b1, f1), 0.0)
    h2 = jnp.maximum(dense(h1, o_w2, f1, o_b2, f2), 0.0)
    a = dense(h2, o_w3, f2, o_b3, dim_action)
    if squash:
        scale = p_ref[o_sc:o_sc + 1, 0:dim_action]
        a = scale * jnp.tanh(a)
    a_ref[...] = a.astype(a_ref.dtype)


# --------------------------------------------------------------------------- #
# Wrapper
# --------------------------------------------------------------------------- #
def td3_actor_forward(state, param_slab, layout, *,
                      squash_and_scale_action=True,
                      batch_tile=512,
                      use_bf16_matmul=False):
    """TD3 actor forward: state (B, dim_state) -> action (B, dim_action)."""
    state = state.astype(jnp.float32)
    B, dim_state = state.shape
    dims = layout["dims"]
    offs = layout["offsets"]
    assert dim_state == dims[0], (dim_state, dims)
    dim_action = dims[3]
    rows, lane = param_slab.shape

    if B <= batch_tile:
        tb = B                                # full-dim block (any B allowed)
    else:
        tb = max(8, (batch_tile // 8) * 8)    # sublane-aligned batch tile
    grid = (pl.cdiv(B, tb),)

    kernel = functools.partial(
        _td3_actor_kernel,
        dims=dims, offs=offs,
        squash=squash_and_scale_action,
        matmul_dtype=jnp.bfloat16 if use_bf16_matmul else jnp.float32)

    return pl.pallas_call(
        kernel,
        out_shape=jax.ShapeDtypeStruct((B, dim_action), jnp.float32),
        grid=grid,
        in_specs=[
            # activation tile: pipelined over the batch grid
            pl.BlockSpec((tb, dim_state), lambda i: (i, 0)),
            # packed params: constant block index -> stays VMEM-resident
            pl.BlockSpec((rows, lane), lambda i: (0, 0)),
        ],
        out_specs=pl.BlockSpec((tb, dim_action), lambda i: (i, 0)),
        compiler_params=pltpu.CompilerParams(
            dimension_semantics=("parallel",)),
    )(state, param_slab)


# --------------------------------------------------------------------------- #
# Init (matches the torch module's initialization scheme)
# --------------------------------------------------------------------------- #
def init_td3_actor_params(key, dim_state, n_features, dim_action):
    f1, f2 = n_features
    ks = jax.random.split(key, 6)

    def u(k, shape, lim):
        return jax.random.uniform(k, shape, jnp.float32, minval=-lim, maxval=lim)

    # weights stored as (in, out) == torch W.T
    w1 = u(ks[0], (dim_state, f1), 1.0 / (dim_state ** 0.5))
    b1 = u(ks[1], (f1,), 1.0 / (dim_state ** 0.5))   # nn.Linear default bias
    w2 = u(ks[2], (f1, f2), 1.0 / (f1 ** 0.5))
    b2 = u(ks[3], (f2,), 1.0 / (f1 ** 0.5))
    w3 = u(ks[4], (f2, dim_action), 0.003)           # uniform(-3e-3, 3e-3)
    b3 = u(ks[5], (dim_action,), 1.0 / (f2 ** 0.5))
    return (w1, b1, w2, b2, w3, b3)


# --------------------------------------------------------------------------- #
# Demo / correctness check
# --------------------------------------------------------------------------- #
if __name__ == "__main__":
    key = jax.random.PRNGKey(0)
    k_state, k_params = jax.random.split(key, 2)

    batch = 2
    dim_state = 12
    n_features = (32, 32)
    dim_action = 4
    action_scaling = jnp.array([1.0, 2.0, 0.5, 1.5], jnp.float32)

    params = init_td3_actor_params(k_params, dim_state, n_features, dim_action)
    slab, layout = pack_td3_actor_params(params, action_scaling, dim_state,
                                         n_features, dim_action)

    state = jax.random.normal(k_state, (batch, dim_state), jnp.float32)

    a = td3_actor_forward(state, slab, layout, squash_and_scale_action=True)
    a = jax.block_until_ready(a)

    # Reference in plain JAX (same math, no Pallas).
    w1, b1, w2, b2, w3, b3 = params
    h1 = jnp.maximum(state @ w1 + b1, 0.0)
    h2 = jnp.maximum(h1 @ w2 + b2, 0.0)
    a_ref = action_scaling * jnp.tanh(h2 @ w3 + b3)

    assert a.shape == (batch, dim_action), a.shape
    assert jnp.allclose(a, a_ref, atol=1e-5), (a, a_ref)

    print("KERNEL_OK")
</pallas_src>

<mosaic_0001>
module attributes {stable_mosaic.version = 11 : i64} {
  func.func @_td3_actor_kernel(%arg0: i32, %arg1: memref<2x12xf32, #tpu.memory_space<vmem>>, %arg2: memref<112x128xf32, #tpu.memory_space<vmem>>, %arg3: memref<2x4xf32, #tpu.memory_space<vmem>>) attributes {dimension_semantics = [#tpu.dimension_semantics<parallel>], iteration_bounds = array<i64: 1>, scalar_prefetch = 0 : i64, scratch_operands = 0 : i64, tpu.core_type = #tpu.core_type<tc>, window_params = [{transform_indices = @transform_0, window_bounds = array<i64: 2, 12>}, {pipeline_mode = #tpu.pipeline_mode<synchronous>, transform_indices = @transform_1, window_bounds = array<i64: 112, 128>}, {transform_indices = @transform_2, window_bounds = array<i64: 2, 4>}]} {
    %c0 = arith.constant 0 : index
    %c0_0 = arith.constant 0 : index
    %0 = vector.load %arg1[%c0, %c0_0] : memref<2x12xf32, #tpu.memory_space<vmem>>, vector<2x12xf32>
    %c0_1 = arith.constant 0 : index
    %c0_2 = arith.constant 0 : index
    %1 = vector.load %arg2[%c0_1, %c0_2] : memref<112x128xf32, #tpu.memory_space<vmem>>, vector<12x32xf32>
    %c16 = arith.constant 16 : index
    %c0_3 = arith.constant 0 : index
    %2 = vector.load %arg2[%c16, %c0_3] : memref<112x128xf32, #tpu.memory_space<vmem>>, vector<1x32xf32>
    %cst = arith.constant dense<0.000000e+00> : vector<2x32xf32>
    %3 = tpu.matmul %0, %1, %cst {dimension_numbers = #tpu.dot_dimension_numbers<[1], [0], [0], [1], [0, 0, 1, 1], [], []>} : vector<2x12xf32>, vector<12x32xf32>, vector<2x32xf32> -> vector<2x32xf32>
    %4 = vector.broadcast %2 : vector<1x32xf32> to vector<2x32xf32>
    %5 = arith.addf %3, %4 : vector<2x32xf32>
    %cst_4 = arith.constant 0.000000e+00 : f32
    %6 = vector.broadcast %cst_4 : f32 to vector<2x32xf32>
    %7 = arith.maximumf %5, %6 : vector<2x32xf32>
    %c24 = arith.constant 24 : index
    %c0_5 = arith.constant 0 : index
    %8 = vector.load %arg2[%c24, %c0_5] : memref<112x128xf32, #tpu.memory_space<vmem>>, vector<32x32xf32>
    %c56 = arith.constant 56 : index
    %c0_6 = arith.constant 0 : index
    %9 = vector.load %arg2[%c56, %c0_6] : memref<112x128xf32, #tpu.memory_space<vmem>>, vector<1x32xf32>
    %cst_7 = arith.constant dense<0.000000e+00> : vector<2x32xf32>
    %10 = tpu.matmul %7, %8, %cst_7 {dimension_numbers = #tpu.dot_dimension_numbers<[1], [0], [0], [1], [0, 0, 1, 1], [], []>} : vector<2x32xf32>, vector<32x32xf32>, vector<2x32xf32> -> vector<2x32xf32>
    %11 = vector.broadcast %9 : vector<1x32xf32> to vector<2x32xf32>
    %12 = arith.addf %10, %11 : vector<2x32xf32>
    %cst_8 = arith.constant 0.000000e+00 : f32
    %13 = vector.broadcast %cst_8 : f32 to vector<2x32xf32>
    %14 = arith.maximumf %12, %13 : vector<2x32xf32>
    %c64 = arith.constant 64 : index
    %c0_9 = arith.constant 0 : index
    %15 = vector.load %arg2[%c64, %c0_9] : memref<112x128xf32, #tpu.memory_space<vmem>>, vector<32x4xf32>
    %c96 = arith.constant 96 : index
    %c0_10 = arith.constant 0 : index
    %16 = vector.load %arg2[%c96, %c0_10] : memref<112x128xf32, #tpu.memory_space<vmem>>, vector<1x4xf32>
    %cst_11 = arith.constant dense<0.000000e+00> : vector<2x4xf32>
    %17 = tpu.matmul %14, %15, %cst_11 {dimension_numbers = #tpu.dot_dimension_numbers<[1], [0], [0], [1], [0, 0, 1, 1], [], []>} : vector<2x32xf32>, vector<32x4xf32>, vector<2x4xf32> -> vector<2x4xf32>
    %18 = vector.broadcast %16 : vector<1x4xf32> to vector<2x4xf32>
    %19 = arith.addf %17, %18 : vector<2x4xf32>
    %c104 = arith.constant 104 : index
    %c0_12 = arith.constant 0 : index
    %20 = vector.load %arg2[%c104, %c0_12] : memref<112x128xf32, #tpu.memory_space<vmem>>, vector<1x4xf32>
    %21 = math.tanh %19 : vector<2x4xf32>
    %22 = vector.broadcast %20 : vector<1x4xf32> to vector<2x4xf32>
    %23 = arith.mulf %22, %21 : vector<2x4xf32>
    %c0_13 = arith.constant 0 : index
    %c0_14 = arith.constant 0 : index
    %24 = vector.load %arg3[%c0_13, %c0_14] : memref<2x4xf32, #tpu.memory_space<vmem>>, vector<2x4xf32>
    tpu.vector_store %arg3[%c0_13, %c0_14], %23 {strides = array<i32>} : memref<2x4xf32, #tpu.memory_space<vmem>>, vector<2x4xf32>,
    return
  }
  func.func @transform_0(%arg0: i32) -> (i32, i32) {
    %c0_i32 = arith.constant 0 : i32
    %c0_i32_0 = arith.constant 0 : i32
    return %arg0, %c0_i32 : i32, i32
  }
  func.func @transform_1(%arg0: i32) -> (i32, i32) {
    %c0_i32 = arith.constant 0 : i32
    %c0_i32_0 = arith.constant 0 : i32
    %c0_i32_1 = arith.constant 0 : i32
    return %c0_i32, %c0_i32_0 : i32, i32
  }
  func.func @transform_2(%arg0: i32) -> (i32, i32) {
    %c0_i32 = arith.constant 0 : i32
    %c0_i32_0 = arith.constant 0 : i32
    return %arg0, %c0_i32 : i32, i32
  }
}

</mosaic_0001>

<bundles_post_ra>
// kernel: tpu_custom_call.1
= control target key start
LH: loop header
LB: loop body
LE: loop exit
PB: predicated region body
PF: predicated region fallthrough
CT: control target
= control target key end

     0   :  { %7 = vsyncpa [#allocation3], 0  ;;  %s535_s0 = inlined_call_operand.hbm [shape: f32[2,12], index: 0, kind: input, shape index: {}]   ;;  %s536_s1 = inlined_call_operand.hbm [shape: f32[112,128], index: 1, kind: input, shape index: {}]   ;;  %s537_s2 = inlined_call_operand.hbm [shape: f32[2,4], index: 2, kind: output, shape index: {}]  }
   0x1   :  { %8 = vsyncpa [#allocation6], 0 }
   0x2   :  { %9 = vsyncpa [#allocation4], 0  ;;  %s465_s9 = smov [#allocation2]   ;;  %s466_s11 = smov [#allocation5]  }
   0x3   :  { %s16_s10 = sshll.u32 %s465_s9, 4  ;;  %s25_s12 = sshll.u32 %s466_s11, 4  ;;  %s17_s10 = int_to_ptr.vmem [resolvable:$true] %s16_s10  ;;  %s489_s12 = int_to_ptr.vmem [resolvable:$true] %s25_s12 }
   0x4   :  { %s393_s15 = scalar_lea.hbm %s535_s0, 32 }
   0x5   :  { %p394_p0 = scmp.ne.s32.totalorder %s535_s0, %s393_s15  ;;  %p397_p1 = scmp.lt.u32.totalorder %s393_s15, %s535_s0 }
   0x7   :  { %p399_p2 = pnand %p397_p1, %p394_p0 }
   0x9   :  { %402 = shalt.err (!%p399_p2)
}
   0xa   :  { %s403_s20 = scalar_lea.vmem %s17_s10, 32  ;;  %p408_p4 = scmp.lt.s32.totalorder %s17_s10, %s17_s10 }
   0xb   :  { %p404_p3 = scmp.ne.s32.totalorder %s17_s10, %s403_s20  ;;  %p409_p5 = scmp.lt.s32.totalorder %s403_s20, %s403_s20 }
   0xd   :  { %p410_p6 = por %p409_p5, %p408_p4 }
   0xf   :  { %p411_p7 = pnand %p410_p6, %p404_p3 }
  0x11   :  { %414 = shalt.err (!%p411_p7)
}
  0x12   :  { %19 = dma.hbm_to_vmem [thread:$0]  %s535_s0, 32, %s17_s10, [#allocation3]  }
  0x13   :  { %s415_s25 = scalar_lea.hbm %s536_s1, 1792 }
  0x14   :  { %p416_p8 = scmp.ne.s32.totalorder %s536_s1, %s415_s25  ;;  %p419_p9 = scmp.lt.u32.totalorder %s415_s25, %s536_s1 }
  0x16   :  { %p421_p10 = pnand %p419_p9, %p416_p8 }
  0x18   :  { %424 = shalt.err (!%p421_p10)
}
  0x19   :  { %s425_s30 = scalar_lea.vmem %s489_s12, 1792  ;;  %p430_p12 = scmp.lt.s32.totalorder %s489_s12, %s489_s12 }
  0x1a   :  { %p426_p11 = scmp.ne.s32.totalorder %s489_s12, %s425_s30  ;;  %p431_p13 = scmp.lt.s32.totalorder %s425_s30, %s425_s30 }
  0x1c   :  { %p432_p0 = por %p431_p13, %p430_p12 }
  0x1e   :  { %p433_p1 = pnand %p432_p0, %p426_p11 }
  0x20   :  { %436 = shalt.err (!%p433_p1)
}
  0x21   :  { %s467_s0 = smov 128   ;;  %s468_s3 = smov 8  }
  0x22   :  { %31 = dma.hbm_to_vmem [thread:$0]  %s536_s1, 1792, %s489_s12, [#allocation6], %s467_s0, %s467_s0, %s468_s3  }
  0x23   :  { %459 = dma.done.wait [#allocation3], 32  }
  0x24   :  { %460 = vsyncadd [#allocation3], 4294967264 }
  0x25   :  { %461 = dma.done.wait [#allocation6], 1792  }
  0x26   :  { %462 = vsyncadd [#allocation6], 4294965504  ;;  %v469_v0 = vmov 0.0|0.0   ;;  %vm470_vm0 = vmmov 0   ;;  %v471_v1 = vmov 0.0   ;;  %vm50_vm1 = vcmask 1043456  }
  0x27   :  { %366 = vmatprep.subr.bf16.mxu0 %v469_v0  ;;  %370 = vmatprep.subr.bf16.mxu1 %v469_v0  ;;  %v39_v2 = vld [vmem:[#allocation5] sm:$0xff]  ;;  %v40_v3 = vld [vmem:[#allocation5 + $0x8] sm:$0xf]  ;;  %vm472_vm2 = vmmov 1   ;;  %v125_v5 = vld [vmem:[#allocation5 + $0x18] sm:$0xff]  ;;  %vm46_vm4 = vcmask 97280  }
  0x28   :  { %341 = vmatprep.mubr.msk.f32.mxu0 %vm470_vm0, %v471_v1  ;;  %352 = vmatprep.mubr.msk.f32.mxu1 %vm470_vm0, %v471_v1  ;;  %vm368_vm3 = vmpackc.low %vm50_vm1, %vm472_vm2  ;;  %v367_v4 = vpack.c.bf16 %v40_v3, %v39_v2  ;;  %v126_v6 = vld [vmem:[#allocation5 + $0x20] sm:$0xff]  ;;  %v38_v8 = vld [vmem:[#allocation2] sm:$0x3]  ;;  %vm134_vm5 = vcmask 261120   ;;  %s473_s1 = smov [#allocation7]   ;;  %vm298_vm6 = vcmask 25600  }
  0x29   :  { %v371_v7 = vpack.c.bf16 %v126_v6, %v125_v5  ;;  %v127_v9 = vld [vmem:[#allocation5 + $0x28] sm:$0xff]  ;;  %v128_v10 = vld [vmem:[#allocation5 + $0x30] sm:$0xff]  ;;  %v209_v12 = vld [vmem:[#allocation5 + $0x40] sm:$0xff]  ;;  %s306_s6 = sshll.u32 %s473_s1, 4  ;;  %s307_s6 = int_to_ptr.vmem [resolvable:$true] %s306_s6 }
  0x2a   :  { %369 = vmatpush3.bf16.msk.msra.mxu0 %vm368_vm3, %v367_v4  ;;  %v374_v11 = vpack.c.bf16 %v128_v10, %v127_v9  ;;  %v210_v13 = vld [vmem:[#allocation5 + $0x48] sm:$0xff]  ;;  %v316_v15 = vld [vmem:[#allocation5 + $0x10] ss:$0 sm:$0xff]  ;;  %v212_v21 = vld [vmem:[#allocation5 + $0x58] sm:$0xff]  ;;  %s437_s7 = scalar_lea.vmem %s307_s6, 32  ;;  %p442_p3 = scmp.lt.s32.totalorder %s307_s6, %s307_s6 }
  0x2b   :  { %372 = vmatpush3.bf16.msra.mxu1 %v371_v7  ;;  %376 = vmatprep.subr.bf16.mxu0 %v469_v0  ;;  %v377_v14 = vpack.c.bf16 %v210_v13, %v209_v12  ;;  %v211_v20 = vld [vmem:[#allocation5 + $0x50] sm:$0xff]  ;;  %v319_v23 = vld [vmem:[#allocation5 + $0x38] ss:$0 sm:$0xff]  ;;  %v321_v28 = vld [vmem:[#allocation5 + $0x60] ss:$0 sm:$0xff]  ;;  %p438_p2 = scmp.ne.s32.totalorder %s307_s6, %s437_s7  ;;  %p443_p4 = scmp.lt.s32.totalorder %s437_s7, %s437_s7 }
  0x2c   :  { %373 = vmatprep.subr.bf16.mxu1 %v469_v0  ;;  %v380_v22 = vpack.c.bf16 %v212_v21, %v211_v20  ;;  %v323_v32 = vld [vmem:[#allocation5 + $0x68] ss:$0 sm:$0xff] }
  0x2d   :  { %342 = vmatmul.mubr.msk.f32.vlgmr.msra.gmra.mrb[0].mxu0 %vm46_vm4, %v38_v8  ;;  %p444_p5 = por %p443_p4, %p442_p3 }
  0x2e   :  { %363 = vmatprep.mubr.msk.f32.mxu0 %vm470_vm0, %v471_v1  ;;  %378 = vmatpush3.bf16.msra.mxu0 %v377_v14 }
  0x2f   :  { %375 = vmatpush3.bf16.msra.mxu1 %v374_v11  ;;  %379 = vmatprep.subr.bf16.mxu0 %v469_v0  ;;  %p445_p6 = pnand %p444_p5, %p438_p2 }
  0x32   :  { %381 = vmatpush3.bf16.msra.mxu0 %v380_v22 }
 0x100   :  { %v120_v16 = vpop.f32.mrb[0].mxu0 }
 0x101   :  { %v121_v17 = vadd.f32 %v316_v15, %v120_v16  ;;  %v343_v18 = vpop.f32.mrb[1].mxu0 }
 0x103   :  { %v124_v19 = vmax.f32 %v121_v17, 0.0 }
 0x105   :  { %353 = vmatmul.mubr.msk.f32.vlgmr.msra.gmra.mrb[0].mxu1 %vm134_vm5, %v124_v19 }
 0x1d8   :  { %v204_v24 = vpop.f32.mrb[0].mxu1 }
 0x1d9   :  { %v205_v25 = vadd.f32 %v319_v23, %v204_v24  ;;  %v354_v26 = vpop.f32.mrb[1].mxu1 }
 0x1db   :  { %v208_v27 = vmax.f32 %v205_v25, 0.0 }
 0x1dd   :  { %364 = vmatmul.mubr.msk.f32.vlgmr.msra.gmra.mrb[2].mxu0 %vm134_vm5, %v208_v27 }
 0x2b0   :  { %v287_v29 = vpop.f32.mrb[2].mxu0 }
 0x2b1   :  { %v288_v30 = vadd.f32 %v321_v28, %v287_v29  ;;  %v365_v31 = vpop.f32.mrb[3].mxu0 }
 0x2b3   :  { %391 = vtanh.f32 %v288_v30 }
 0x2bd   :  { %v392_v33 = vpop.eup %391 }
 0x2be   :  { %v297_v34 = vmul.f32 %v392_v33, %v323_v32 }
 0x2c0   :  { %299 = vst.msk [vmem:[#allocation7] sm:$0x3] %vm298_vm6, %v297_v34 }
 0x2c1   :  { %448 = shalt.err (!%p445_p6)
}
 0x2c2   :  { %s449_s10 = scalar_lea.hbm %s537_s2, 32 }
 0x2c3   :  { %p450_p7 = scmp.ne.s32.totalorder %s537_s2, %s449_s10  ;;  %p453_p8 = scmp.lt.u32.totalorder %s449_s10, %s537_s2 }
 0x2c5   :  { %p455_p9 = pnand %p453_p8, %p450_p7 }
 0x2c7   :  { %458 = shalt.err (!%p455_p9)
}
 0x2c8   :  { %309 = dma.vmem_to_hbm [thread:$0]  %s307_s6, 32, %s537_s2, [#allocation4]  }
 0x2c9   :  { %463 = dma.done.wait [#allocation4], 32  }
 0x2ca   :  { %464 = vsyncadd [#allocation4], 4294967264 }
 0x2cb   :  { %313 = vsyncpa [#allocation3], 1 }
 0x2cc   :  { %314 = vsyncpa [#allocation6], 1 }
 0x2cd   :  { %315 = vsyncpa [#allocation4], 1 }

</bundles_post_ra>
